<compile_context>
chip_gen: v7x
topology: tpu7x:2x2x1
jax: 0.10.0
libtpu: 0.0.40
codegen_flags: <defaults>
</compile_context>

<pallas_src>
import functools

import jax
import jax.numpy as jnp
from jax import lax
from jax.experimental import pallas as pl
from jax.experimental.pallas import tpu as pltpu

LN_EPS = 1e-5


def channel_mlp_kernel(x_ref, w_ref, p_ref, o_ref):
    # x_ref: (tile, D_in)   w_ref: (D_in, D_out)
    # p_ref: (3, D_out)  rows = [bias, gamma, beta]
    # o_ref: (tile, D_out)

    # Linear (MXU, f32 accumulation) + bias
    h = jnp.dot(x_ref[...], w_ref[...], preferred_element_type=jnp.float32)
    h = h + p_ref[0:1, :].astype(jnp.float32)

    # ReLU
    h = jnp.maximum(h, 0.0)

    # LayerNorm over the feature dim (two-pass: mean, then centered variance).
    inv_d = 1.0 / h.shape[-1]
    mean = jnp.sum(h, axis=-1, keepdims=True) * inv_d
    c = h - mean
    var = jnp.sum(c * c, axis=-1, keepdims=True) * inv_d
    inv = lax.rsqrt(var + LN_EPS)
    out = c * inv
    out = out * p_ref[1:2, :].astype(jnp.float32) + p_ref[2:3, :].astype(jnp.float32)

    # Dropout: inference mode -> identity.
    o_ref[...] = out.astype(o_ref.dtype)


def _round_up(x, m):
    return ((x + m - 1) // m) * m


def _cdiv(a, b):
    return (a + b - 1) // b


def _vmem_capacity_bytes():
    # Generation-aware VMEM size; conservative fallback = v7x per-TC 64 MiB,
    # which is also safe on v5e/v6e (128 MiB).
    try:
        return int(pltpu.get_tpu_info().vmem_capacity_bytes)
    except Exception:
        return 64 * 1024 * 1024


@functools.partial(jax.jit, static_argnames=("tm",))
def channel_mlp(x, w, b, gamma, beta, *, tm=4096):
    """x: (..., D_in) -> (..., D_out). Fused Linear+ReLU+LayerNorm in Pallas."""
    orig_shape = x.shape
    d_in = orig_shape[-1]
    d_out = w.shape[1]

    x2 = x.reshape(-1, d_in)
    n_rows = x2.shape[0]

    itemsize = jnp.dtype(x.dtype).itemsize
    w_itemsize = jnp.dtype(w.dtype).itemsize
    p_itemsize = jnp.dtype(b.dtype).itemsize

    # Resident parameter block: weight + packed [bias, gamma, beta].
    resident_bytes = d_in * d_out * w_itemsize + 3 * d_out * p_itemsize
    # Constant-index inputs don't need double buffering; only request single
    # buffering when the resident block is big enough for the 2x copy to eat
    # into VMEM headroom (realistic ChannelMLP widths). The tiny toy-sized
    # block stays on the default path.
    single_buffer_resident = resident_bytes >= (1 << 20)
    resident_bufs = 1 if single_buffer_resident else 2

    # VMEM budget: cap at 75% of physical VMEM (v7x-safe), minus resident
    # params and slack; derive the largest affordable row tile from it.
    vmem_cap = (3 * _vmem_capacity_bytes()) // 4
    per_row_bytes = 2 * (d_in + d_out) * itemsize          # double-buffered x/out tiles
    budget = vmem_cap - resident_bufs * resident_bytes - (4 << 20)
    tm_budget = max(64, (budget // per_row_bytes) // 8 * 8)
    tm_eff = max(8, min(tm, tm_budget))

    # Row-tile selection: large tiles amortize per-grid-step overhead; ensure
    # >= 2 grid steps when there is enough work so v7x's two TensorCores both
    # get rows; size tile from cdiv(rows, steps) so zero-row padding stays
    # bounded by a few sublanes.
    n_pad8 = _round_up(n_rows, 8)
    min_steps = 2 if n_pad8 >= 16 else 1
    n_steps = max(min_steps, _cdiv(n_pad8, tm_eff))
    tile = min(tm_eff, _round_up(_cdiv(n_pad8, n_steps), 8))
    n_steps = _cdiv(n_pad8, tile)
    n_padded = n_steps * tile
    if n_padded != n_rows:
        x2 = jnp.pad(x2, ((0, n_padded - n_rows), (0, 0)))

    # Pack bias / LN gamma / LN beta into one resident (3, D_out) buffer.
    params = jnp.stack(
        [b.reshape(d_out), gamma.reshape(d_out), beta.reshape(d_out)], axis=0
    )

    needed = resident_bufs * resident_bytes + 2 * tile * (d_in + d_out) * itemsize
    vmem_limit = int(min(vmem_cap, max(needed + (8 << 20), 32 << 20)))

    if single_buffer_resident:
        w_spec = pl.BlockSpec((d_in, d_out), lambda i: (0, 0),
                              pipeline_mode=pl.Buffered(1))
        p_spec = pl.BlockSpec((3, d_out), lambda i: (0, 0),
                              pipeline_mode=pl.Buffered(1))
    else:
        w_spec = pl.BlockSpec((d_in, d_out), lambda i: (0, 0))
        p_spec = pl.BlockSpec((3, d_out), lambda i: (0, 0))

    out2 = pl.pallas_call(
        channel_mlp_kernel,
        out_shape=jax.ShapeDtypeStruct((n_padded, d_out), x.dtype),
        grid_spec=pltpu.PrefetchScalarGridSpec(
            num_scalar_prefetch=0,
            grid=(n_steps,),
            in_specs=[
                pl.BlockSpec((tile, d_in), lambda i: (i, 0)),   # x rows
                w_spec,                                         # weight (resident)
                p_spec,                                         # bias/gamma/beta
            ],
            out_specs=pl.BlockSpec((tile, d_out), lambda i: (i, 0)),
        ),
        compiler_params=pltpu.CompilerParams(
            dimension_semantics=("parallel",),
            vmem_limit_bytes=vmem_limit,
        ),
    )(x2, w, params)

    return out2[:n_rows].reshape(*orig_shape[:-1], d_out)


def reference(x, w, b, gamma, beta):
    h = jnp.dot(x.astype(jnp.float32), w.astype(jnp.float32)) + b
    h = jnp.maximum(h, 0.0)
    mean = jnp.mean(h, axis=-1, keepdims=True)
    var = jnp.mean((h - mean) ** 2, axis=-1, keepdims=True)
    h = (h - mean) * lax.rsqrt(var + LN_EPS)
    return h * gamma + beta


if __name__ == "__main__":
    # Shapes consistent with the module: nb_channels (input_dim) = 16,
    # output_dim = 256; input x of shape (batch, seq, input_dim).
    input_dim = 16
    output_dim = 256
    batch, seq = 2, 8

    key = jax.random.PRNGKey(0)
    kx, kw, kb, kg, kbe, kx2, kx3 = jax.random.split(key, 7)

    x = jax.random.normal(kx, (batch, seq, input_dim), dtype=jnp.float32)

    # Deterministic synthetic parameter init (PyTorch-like uniform fan-in scale).
    bound = 1.0 / (input_dim ** 0.5)
    w = jax.random.uniform(kw, (input_dim, output_dim), jnp.float32, -bound, bound)
    b = jax.random.uniform(kb, (output_dim,), jnp.float32, -bound, bound)
    # nn.LayerNorm default init is ones/zeros; perturb slightly (deterministic)
    # so the affine path is actually exercised.
    gamma = 1.0 + 0.01 * jax.random.normal(kg, (output_dim,), jnp.float32)
    beta = 0.01 * jax.random.normal(kbe, (output_dim,), jnp.float32)

    # Case 1: tiny input -> still split into 2 grid steps (v7x dual-TC path),
    # tile = 8 rows, no padding.
    out = channel_mlp(x, w, b, gamma, beta)
    out = jax.block_until_ready(out)
    ref = reference(x, w, b, gamma, beta)
    assert out.shape == (batch, seq, output_dim), out.shape
    assert jnp.allclose(out, ref, atol=1e-4, rtol=1e-4), float(
        jnp.max(jnp.abs(out - ref))
    )

    # Case 2: awkward row count (3*300 = 900) -> 2 steps of 456 rows,
    # exercising the bounded row-padding / slicing path.
    x_big = jax.random.normal(kx2, (3, 300, input_dim), dtype=jnp.float32)
    out_big = channel_mlp(x_big, w, b, gamma, beta)
    out_big = jax.block_until_ready(out_big)
    ref_big = reference(x_big, w, b, gamma, beta)
    assert out_big.shape == (3, 300, output_dim), out_big.shape
    assert jnp.allclose(out_big, ref_big, atol=1e-4, rtol=1e-4), float(
        jnp.max(jnp.abs(out_big - ref_big))
    )

    # Case 3: 4*2048 = 8192 rows -> 2 steps of the full 4096-row tile,
    # exercising the large-tile (overhead-amortizing) path with no padding.
    x_huge = jax.random.normal(kx3, (4, 2048, input_dim), dtype=jnp.float32)
    out_huge = channel_mlp(x_huge, w, b, gamma, beta)
    out_huge = jax.block_until_ready(out_huge)
    ref_huge = reference(x_huge, w, b, gamma, beta)
    assert out_huge.shape == (4, 2048, output_dim), out_huge.shape
    assert jnp.allclose(out_huge, ref_huge, atol=1e-4, rtol=1e-4), float(
        jnp.max(jnp.abs(out_huge - ref_huge))
    )

    print("KERNEL_OK")
</pallas_src>

<mosaic_0001>
module attributes {stable_mosaic.version = 11 : i64} {
  func.func @channel_mlp_kernel(%arg0: i32, %arg1: memref<8x16xf32, #tpu.memory_space<vmem>>, %arg2: memref<16x256xf32, #tpu.memory_space<vmem>>, %arg3: memref<3x256xf32, #tpu.memory_space<vmem>>, %arg4: memref<8x256xf32, #tpu.memory_space<vmem>>) attributes {dimension_semantics = [#tpu.dimension_semantics<parallel>], iteration_bounds = array<i64: 2>, scalar_prefetch = 0 : i64, scratch_operands = 0 : i64, tpu.core_type = #tpu.core_type<tc>, window_params = [{transform_indices = @transform_0, window_bounds = array<i64: 8, 16>}, {pipeline_mode = #tpu.pipeline_mode<synchronous>, transform_indices = @transform_1, window_bounds = array<i64: 16, 256>}, {pipeline_mode = #tpu.pipeline_mode<synchronous>, transform_indices = @transform_2, window_bounds = array<i64: 3, 256>}, {transform_indices = @transform_3, window_bounds = array<i64: 8, 256>}]} {
    %c0 = arith.constant 0 : index
    %c0_0 = arith.constant 0 : index
    %0 = vector.load %arg1[%c0, %c0_0] : memref<8x16xf32, #tpu.memory_space<vmem>>, vector<8x16xf32>
    %c0_1 = arith.constant 0 : index
    %c0_2 = arith.constant 0 : index
    %1 = vector.load %arg2[%c0_1, %c0_2] : memref<16x256xf32, #tpu.memory_space<vmem>>, vector<16x256xf32>
    %cst = arith.constant dense<0.000000e+00> : vector<8x256xf32>
    %2 = tpu.matmul %0, %1, %cst {dimension_numbers = #tpu.dot_dimension_numbers<[1], [0], [0], [1], [0, 0, 1, 1], [], []>} : vector<8x16xf32>, vector<16x256xf32>, vector<8x256xf32> -> vector<8x256xf32>
    %c0_3 = arith.constant 0 : index
    %c0_4 = arith.constant 0 : index
    %3 = vector.load %arg3[%c0_3, %c0_4] : memref<3x256xf32, #tpu.memory_space<vmem>>, vector<1x256xf32>
    %4 = vector.broadcast %3 : vector<1x256xf32> to vector<8x256xf32>
    %5 = arith.addf %2, %4 : vector<8x256xf32>
    %cst_5 = arith.constant 0.000000e+00 : f32
    %6 = vector.broadcast %cst_5 : f32 to vector<8x256xf32>
    %7 = arith.maximumf %5, %6 : vector<8x256xf32>
    %cst_6 = arith.constant dense<0.000000e+00> : vector<8xf32>
    %8 = vector.multi_reduction <add>, %7, %cst_6 [1] : vector<8x256xf32> to vector<8xf32>
    %9 = vector.shape_cast %8 : vector<8xf32> to vector<8x1xf32>
    %cst_7 = arith.constant 3.906250e-03 : f32
    %10 = vector.broadcast %cst_7 : f32 to vector<8x1xf32>
    %11 = arith.mulf %9, %10 : vector<8x1xf32>
    %12 = vector.broadcast %11 : vector<8x1xf32> to vector<8x256xf32>
    %13 = arith.subf %7, %12 : vector<8x256xf32>
    %14 = arith.mulf %13, %13 : vector<8x256xf32>
    %cst_8 = arith.constant dense<0.000000e+00> : vector<8xf32>
    %15 = vector.multi_reduction <add>, %14, %cst_8 [1] : vector<8x256xf32> to vector<8xf32>
    %16 = vector.shape_cast %15 : vector<8xf32> to vector<8x1xf32>
    %cst_9 = arith.constant 3.906250e-03 : f32
    %17 = vector.broadcast %cst_9 : f32 to vector<8x1xf32>
    %18 = arith.mulf %16, %17 : vector<8x1xf32>
    %cst_10 = arith.constant 9.99999974E-6 : f32
    %19 = vector.broadcast %cst_10 : f32 to vector<8x1xf32>
    %20 = arith.addf %18, %19 : vector<8x1xf32>
    %21 = math.rsqrt %20 : vector<8x1xf32>
    %22 = vector.broadcast %21 : vector<8x1xf32> to vector<8x256xf32>
    %23 = arith.mulf %13, %22 : vector<8x256xf32>
    %c1 = arith.constant 1 : index
    %c0_11 = arith.constant 0 : index
    %24 = vector.load %arg3[%c1, %c0_11] : memref<3x256xf32, #tpu.memory_space<vmem>>, vector<1x256xf32>
    %25 = vector.broadcast %24 : vector<1x256xf32> to vector<8x256xf32>
    %26 = arith.mulf %23, %25 : vector<8x256xf32>
    %c2 = arith.constant 2 : index
    %c0_12 = arith.constant 0 : index
    %27 = vector.load %arg3[%c2, %c0_12] : memref<3x256xf32, #tpu.memory_space<vmem>>, vector<1x256xf32>
    %28 = vector.broadcast %27 : vector<1x256xf32> to vector<8x256xf32>
    %29 = arith.addf %26, %28 : vector<8x256xf32>
    %c0_13 = arith.constant 0 : index
    %c0_14 = arith.constant 0 : index
    %30 = vector.load %arg4[%c0_13, %c0_14] : memref<8x256xf32, #tpu.memory_space<vmem>>, vector<8x256xf32>
    tpu.vector_store %arg4[%c0_13, %c0_14], %29 {strides = array<i32>} : memref<8x256xf32, #tpu.memory_space<vmem>>, vector<8x256xf32>,
    return
  }
  func.func @transform_0(%arg0: i32) -> (i32, i32) {
    %c0_i32 = arith.constant 0 : i32
    %c0_i32_0 = arith.constant 0 : i32
    return %arg0, %c0_i32 : i32, i32
  }
  func.func @transform_1(%arg0: i32) -> (i32, i32) {
    %c0_i32 = arith.constant 0 : i32
    %c0_i32_0 = arith.constant 0 : i32
    %c0_i32_1 = arith.constant 0 : i32
    return %c0_i32, %c0_i32_0 : i32, i32
  }
  func.func @transform_2(%arg0: i32) -> (i32, i32) {
    %c0_i32 = arith.constant 0 : i32
    %c0_i32_0 = arith.constant 0 : i32
    %c0_i32_1 = arith.constant 0 : i32
    return %c0_i32, %c0_i32_0 : i32, i32
  }
  func.func @transform_3(%arg0: i32) -> (i32, i32) {
    %c0_i32 = arith.constant 0 : i32
    %c0_i32_0 = arith.constant 0 : i32
    return %arg0, %c0_i32 : i32, i32
  }
}

</mosaic_0001>

<bundles_post_ra>
// kernel: channel_mlp.1
= control target key start
LH: loop header
LB: loop body
LE: loop exit
PB: predicated region body
PF: predicated region fallthrough
CT: control target
= control target key end

     0   :  { %8 = vsyncpa [#allocation3], 0  ;;  %s787_s0 = inlined_call_operand.hbm [shape: f32[16,16], index: 0, kind: input, shape index: {}]   ;;  %s788_s1 = inlined_call_operand.vmem [shape: f32[16,256], index: 1, kind: input, shape index: {}]   ;;  %s789_s2 = inlined_call_operand.vmem [shape: f32[3,256], index: 2, kind: input, shape index: {}]   ;;  %s790_s3 = inlined_call_operand.hbm [shape: f32[16,256], index: 3, kind: output, shape index: {}]  }
   0x1   :  { %10 = vsyncpa [#allocation3 + $0x1], 0 }
   0x2   :  { %11 = vsyncpa [#allocation4], 0 }
   0x3   :  { %13 = vsyncpa [#allocation4 + $0x1], 0  ;;  %s604_s12 = smov 0   ;;  %s606_s13 = smov 0  }
   0x4   :  { %s608_s14 = smov 0   ;;  %s610_s15 = smov 0  }
   0x5 LB: > { %s625_s16 = sadd.s32 4294967295, %s579_s15   ;;  %s413_s17 = sadd.s32 4294967294, %s579_s15   ;;  %s579_s15 = sphi %s610_s15, %s805_s15   ;;  %s575_s14 = sphi %s608_s14, %s804_s14   ;;  %s571_s13 = sphi %s606_s13, %s803_s13   ;;  %s567_s12 = sphi %s604_s12, %s802_s12  }
   0x6   : > { %s629_s18 = sadd.s32 1, %s579_s15   ;;  %s26_s19 = sadd.s32 1, %s575_s14 }
   0x7   : > { %s23_s20 = ssub.s32 %s579_s15, %s629_s18  ;;  %p33_p0 = scmp.ne.s32.totalorder %s575_s14, %s571_s13 }
   0x8   : > { %p24_p1 = scmp.eq.s32.totalorder %s23_s20, 0  ;;  %p34_p2 = scmp.eq.s32.totalorder %s579_s15, 0 }
   0x9   : > { %p39_p3 = scmp.ne.s32.totalorder %s571_s13, %s567_s12  ;;  %p40_p4 = scmp.eq.s32.totalorder %s625_s16, 0 }
   0xa   : > { %s641_s21 = scalar_select %p24_p1, %s575_s14, %s26_s19  }
   0xb   : > { %p643_p5 = por %p34_p2, %p33_p0  ;;  %p647_p6 = por %p40_p4, %p39_p3 }
   0xc   : > { %p105_p7 = scmp.eq.s32.totalorder %s625_s16, 1  ;;  %p111_p8 = scmp.eq.s32.totalorder %s413_s17, 1 }
   0xd   : > { %p446_p10 = scmp.lt.s32.totalorder %s579_s15, 2  ;;  %s137_s26 = sand.u32 1, %s575_s14  }
   0xe   : > { %p654_p11 = por %p105_p7, %p33_p0  ;;  %p658_p12 = por %p111_p8, %p39_p3 }
   0xf   : > { %s417_s27 = sshll.u32 %s579_s15, 7  ;;  %s416_s28 = sshll.u32 %s137_s26, 3 }
  0x10   : > { %s794_s24 = scalar_select %p654_p11, 1, 0 }
  0x11   : > { %s795_s25 = scalar_select %p658_p12, 1, 0 }
  0x12   : > { %s667_s4 = scalar_lea.hbm %s787_s0, %s417_s27  ;;  %s141_s5 = scalar_lea.vmem [#allocation2], %s416_s28 }
  0x13   : > { %s148_s6 = sshll.u32 %s141_s5, 4  ;;  %p671_p13 = pnand %p446_p10, %p643_p5  ;;  %s675_s6 = int_to_ptr.vmem [resolvable:$true] %s148_s6 }
  0x14   : > { %s138_s8 = scalar_lea.sflag [#allocation3], %s137_s26  ;;  %s483_s9 = scalar_lea.hbm %s667_s4, 128 }
  0x15   : > { %p484_p2 = scmp.ne.s32.totalorder %s667_s4, %s483_s9  ;;  %p485_p3 = pneg %p671_p13 }
  0x16   : > { %s488_s17 = scalar_lea.hbm %s787_s0, 256  ;;  %p489_p5 = scmp.lt.u32.totalorder %s667_s4, %s787_s0 }
  0x17   : > { %p486_p4 = pnand %p485_p3, %p484_p2  ;;  %p490_p8 = scmp.lt.u32.totalorder %s488_s17, %s483_s9 }
  0x18   : > { %p492_p9 = scmp.lt.u32.totalorder %s483_s9, %s667_s4 }
  0x19   : > { %p487_p7 = pneg %p486_p4  ;;  %p491_p10 = por %p490_p8, %p489_p5 }
  0x1b   : > { %p493_p0 = por %p492_p9, %p491_p10 }
  0x1d   : > { %p494_p1 = pnand %p493_p0, %p487_p7 }
  0x1f   : > { %497 = shalt.err (!%p494_p1)
}
  0x20   : > { %s498_s22 = scalar_lea.vmem %s675_s6, 128  ;;  %s581_s26 = smov [#allocation2]  }
  0x21   : > { %p499_p2 = scmp.ne.s32.totalorder %s675_s6, %s498_s22  ;;  %s503_s27 = sshll.u32 %s581_s26, 4  ;;  %s504_s27 = int_to_ptr.vmem [resolvable:$false] %s503_s27 }
  0x22   : > { %s505_s28 = scalar_lea.vmem %s504_s27, 256  ;;  %p506_p11 = scmp.lt.s32.totalorder %s675_s6, %s504_s27 }
  0x23   : > { %p501_p4 = pnand %p499_p2, %p485_p3  ;;  %p507_p5 = scmp.lt.s32.totalorder %s505_s28, %s498_s22 }
  0x25   : > { %p502_p12 = pneg %p501_p4  ;;  %p508_p8 = por %p507_p5, %p506_p11 }
  0x27   : > { %p509_p9 = pnand %p508_p8, %p502_p12 }
  0x29   : > { %512 = shalt.err (!%p509_p9)
}
  0x2a   : > { %441 = dma.hbm_to_vmem [thread:$0]  (!%p671_p13), %s667_s4, 128, %s675_s6, %s138_s8  }
  0x2b   : > { %p797_p0 = scmp.lt.s32.totalorder %s579_s15, 3  ;;  %p798_p1 = scmp.ge.s32.totalorder %s579_s15, 1 }
  0x2d   : > { %p154_p3 = pnand %p798_p1, %p797_p0 }
  0x2e   : > { %s709_s29 = sand.u32 (!%p154_p3), 1, %s571_s13  }
  0x2f   : > { %157 = sbr.rel (%p154_p3) target bundleno = 608 (0x260), region = 32  ;;  %s419_s30 = sshll.u32 (!%p154_p3), %s709_s29, 3 }
  0x30   : > { %s160_s5 = scalar_lea.sflag (!%p154_p3), [#allocation3], %s709_s29  ;;  %s163_s9 = scalar_lea.vmem (!%p154_p3), [#allocation2], %s419_s30 }
  0x36   : > { %558 = dma.done.wait (%p647_p6), %s160_s5, 128  }
  0x37   : > { %560 = vsyncadd (%p647_p6), %s160_s5, 4294967168  ;;  %v582_v0 = vmov 0.0   ;;  %v188_v1 = vld [vmem:[%s788_s1 + $0x8] sm:$0xff]  ;;  %v190_v2 = vld [vmem:[%s788_s1 + $0x18] sm:$0xff]  ;;  %vm203_vm0 = vcmask 130048   ;;  %v193_v8 = vlaneseq  ;;  %s420_s27 = sshll.u32 %s709_s29, 4 }
  0x38   : > { %271 = vmatprep.mubr.f32.mxu0 %v582_v0  ;;  %v187_v3 = vld [vmem:[%s788_s1] sm:$0xff]  ;;  %v430_v4 = vpack.c.bf16 %v190_v2, %v188_v1  ;;  %v189_v5 = vld [vmem:[%s788_s1 + $0x10] sm:$0xff]  ;;  %s429_s5 = sshll.u32 %s625_s16, 8  ;;  %s329_s10 = scalar_lea.sflag [#allocation4], %s709_s29 }
  0x39   : > { %v432_v6 = vpack.c.bf16 %v189_v5, %v187_v3  ;;  %v186_v7 = vld [vmem:[%s163_s9] sm:$0xff]  ;;  %v194_v9 = vshrl.u32 %v193_v8, 7  ;;  %s185_s9 = scalar_lea.vmem [#allocation5], %s420_s27  ;;  %s743_s8 = scalar_lea.hbm %s790_s3, %s429_s5 }
  0x3a   : > { %431 = vmatprep.subr.bf16.mxu0 %v430_v4  ;;  %v191_v11 = vld [vmem:[%s789_s2] ss:$4 sm:$0x3]  ;;  %v422_v32 = vld [vmem:[%s789_s2 + $0x1] ss:$4 sm:$0x3] }
  0x3b   : > { %433 = vmatpush1.bf16.msra.mxu0 %v432_v6  ;;  %v195_v10 = vsub.s32 0, %v194_v9  ;;  %v199_v12 = vsub.s32 1, %v194_v9  ;;  %v423_v33 = vld [vmem:[%s789_s2 + $0x2] ss:$4 sm:$0x3]  ;;  %s343_s4 = sshll.u32 %s185_s9, 4  ;;  %s745_s4 = int_to_ptr.vmem [resolvable:$true] %s343_s4 }
  0x3c   : > { %s513_s16 = scalar_lea.vmem %s745_s4, 256  ;;  %p799_p11 = scmp.ne.s32.totalorder %s794_s24, 0 }
  0x3d   : > { %v196_v13 = vrot.slane %v191_v11, %v195_v10  ;;  %v200_v14 = vrot.slane %v191_v11, %v199_v12  ;;  %v302_v34 = vrot.slane %v422_v32, %v195_v10  ;;  %v306_v35 = vrot.slane %v422_v32, %v199_v12  ;;  %p514_p6 = scmp.ne.s32.totalorder %s745_s4, %s513_s16  ;;  %s583_s11 = smov [#allocation5]  }
  0x3e   : > { %421 = vmatmul.mubr.msk.f32.vlgmr.msra.gmra.mrb[0].mxu0 %vm203_vm0, %v186_v7  ;;  %v317_v37 = vrot.slane %v423_v33, %v195_v10  ;;  %v321_v38 = vrot.slane %v423_v33, %v199_v12  ;;  %s517_s17 = sshll.u32 %s583_s11, 4  ;;  %s518_s17 = int_to_ptr.vmem [resolvable:$false] %s517_s17 }
  0x3f   : > { %p515_p12 = pnand %p514_p6, %p799_p11  ;;  %s519_s19 = scalar_lea.vmem %s518_s17, 512 }
  0x40   : > { %p520_p7 = scmp.lt.s32.totalorder %s745_s4, %s518_s17  ;;  %p521_p10 = scmp.lt.s32.totalorder %s519_s19, %s513_s16 }
  0x41   : > { %p516_p13 = pneg %p515_p12 }
  0x42   : > { %p522_p2 = por %p521_p10, %p520_p7 }
  0x44   : > { %p523_p4 = pnand %p522_p2, %p516_p13 }
 0x111   : > { %v273_v15 = vpop.f32.mrb[0].mxu0 }
 0x112   : > { %v274_v16 = vadd.f32 %v273_v15, %v196_v13  ;;  %v275_v17 = vpop.f32.mrb[1].mxu0 }
 0x113   : > { %v276_v18 = vadd.f32 %v275_v17, %v200_v14 }
 0x114   : > { %v278_v19 = vmax.f32 %v274_v16, 0.0 }
 0x115   : > { %v279_v20 = vmax.f32 %v276_v18, 0.0 }
 0x117   : > { %v280_v21 = vadd.f32 %v279_v20, %v278_v19 }
 0x119   : > { %281 = vadd.xlane.f32.xlu0 %v280_v21 }
 0x1a6   : > { %v282_v22 = vpop.xlane.xlu0 %281 }
 0x1a7   : > { %v283_v23 = vmul.f32 0.00390625, %v282_v22 }
 0x1a9   : > { %v284_v24 = vsub.f32 %v278_v19, %v283_v23  ;;  %v285_v25 = vsub.f32 %v279_v20, %v283_v23 }
 0x1ab   : > { %v286_v26 = vmul.f32 %v284_v24, %v284_v24  ;;  %v287_v27 = vmul.f32 %v285_v25, %v285_v25 }
 0x1ad   : > { %v288_v28 = vadd.f32 %v287_v27, %v286_v26 }
 0x1af   : > { %289 = vadd.xlane.f32.xlu0 %v288_v28 }
 0x23c   : > { %v290_v29 = vpop.xlane.xlu0 %289 }
 0x23d   : > { %v291_v30 = vmul.f32 0.00390625, %v290_v29 }
 0x23f   : > { %v292_v31 = vadd.f32 1e-05, %v291_v30 }
 0x241   : > { %481 = vrsqrt.f32 %v292_v31 }
 0x24b   : > { %v482_v36 = vpop.eup %481 }
 0x24c   : > { %v294_v39 = vmul.f32 %v482_v36, %v284_v24  ;;  %v295_v40 = vmul.f32 %v482_v36, %v285_v25 }
 0x24e   : > { %v309_v41 = vmul.f32 %v302_v34, %v294_v39  ;;  %v310_v42 = vmul.f32 %v306_v35, %v295_v40 }
 0x250   : > { %v324_v43 = vadd.f32 %v317_v37, %v309_v41  ;;  %v325_v44 = vadd.f32 %v321_v38, %v310_v42 }
 0x252   : > { %326 = vst [vmem:[%s185_s9] sm:$0xff] %v324_v43  ;;  %327 = vst [vmem:[%s185_s9 + $0x8] sm:$0xff] %v325_v44 }
 0x253   : > { %526 = shalt.err (!%p523_p4)
}
 0x254   : > { %s527_s29 = scalar_lea.hbm %s743_s8, 256  ;;  %s531_s22 = scalar_lea.hbm %s790_s3, 512 }
 0x255   : > { %p528_p5 = scmp.ne.s32.totalorder %s743_s8, %s527_s29  ;;  %p532_p0 = scmp.lt.u32.totalorder %s743_s8, %s790_s3 }
 0x256   : > { %p533_p1 = scmp.lt.u32.totalorder %s531_s22, %s527_s29  ;;  %p535_p6 = scmp.lt.u32.totalorder %s527_s29, %s743_s8 }
 0x257   : > { %p529_p8 = pnand %p528_p5, %p799_p11 }
 0x258   : > { %p534_p3 = por %p533_p1, %p532_p0 }
 0x259   : > { %p530_p9 = pneg %p529_p8 }
 0x25a   : > { %p536_p12 = por %p535_p6, %p534_p3 }
 0x25c   : > { %p537_p13 = pnand %p536_p12, %p530_p9 }
 0x25e   : > { %540 = shalt.err (!%p537_p13)
}
 0x25f   : > { %436 = dma.vmem_to_hbm [thread:$0]  (%p799_p11), %s745_s4, 256, %s743_s8, %s329_s10  }
 0x260 PF: > { %s355_s28 = sand.u32 1, %s567_s12   ;;  %p800_p7 = scmp.ne.s32.totalorder %s795_s25, 0 }
 0x261   : > { %p801_p10 = scmp.ge.s32.totalorder %s579_s15, 2  ;;  %s356_s30 = scalar_lea.sflag [#allocation4], %s355_s28 }
 0x263   : > { %p443_p2 = pnand %p801_p10, %p800_p7 }
 0x265   : > { %562 = dma.done.wait (!%p443_p2), %s356_s30, 256  }
 0x266   : > { %564 = vsyncadd (!%p443_p2), %s356_s30, 4294967040  ;;  %p16_p4 = scmp.ge.s32.totalorder %s629_s18, 4   ;;  %s802_s12 = smov %s571_s13 }
 0x267   : > { %s803_s13 = smov %s575_s14  ;;  %s804_s14 = smov %s641_s21 }
 0x268   : > { %s805_s15 = smov %s629_s18  ;;  %18 = sbr.rel (!%p16_p4) target bundleno = 5 (0x5), region = 79 }
 0x26f   :  { %361 = vsyncpa [#allocation3], 1 }
 0x270   :  { %363 = vsyncpa [#allocation3 + $0x1], 1 }
 0x271   :  { %364 = vsyncpa [#allocation4], 1 }
 0x272   :  { %366 = vsyncpa [#allocation4 + $0x1], 1 }

</bundles_post_ra>
